<compile_context>
chip_gen: v7x
topology: tpu7x:2x2x1
jax: 0.10.0
libtpu: 0.0.40
codegen_flags: <defaults>
</compile_context>

<pallas_src>
import jax
import jax.numpy as jnp
from jax.experimental import pallas as pl
from jax.experimental.pallas import tpu as pltpu


# ---------------------------------------------------------------------------
# Fused kernel: whole problem in one invocation (no grid).
#   sup_ref : (S, N, N)   support matrices A_s
#   w1_ref  : (S, N, Hp)  layer-1 weights, hidden dim zero-padded to Hp=128k
#   w2_ref  : (S, Hp, Cp) layer-2 weights, class dim zero-padded to Cp=128k
#   o_ref   : (N, Cp)
# ---------------------------------------------------------------------------
def gcn_fused_kernel(sup_ref, w1_ref, w2_ref, o_ref):
    num_support = sup_ref.shape[0]  # static Python int

    # Layer 1 (featureless): h = relu( sum_s A_s @ W1_s )
    h = jnp.dot(sup_ref[0], w1_ref[0], preferred_element_type=jnp.float32)
    for s in range(1, num_support):
        h = h + jnp.dot(sup_ref[s], w1_ref[s],
                        preferred_element_type=jnp.float32)
    h = jnp.maximum(h, 0.0)  # (N, Hp)

    # Layer 2: out = sum_s A_s @ (h @ W2_s)  (same summation order as PyTorch),
    # accumulated in vregs -- no staging buffer, written to o_ref exactly once.
    out = jnp.dot(sup_ref[0],
                  jnp.dot(h, w2_ref[0], preferred_element_type=jnp.float32),
                  preferred_element_type=jnp.float32)
    for s in range(1, num_support):
        out = out + jnp.dot(
            sup_ref[s],
            jnp.dot(h, w2_ref[s], preferred_element_type=jnp.float32),
            preferred_element_type=jnp.float32)
    o_ref[...] = out


# ---------------------------------------------------------------------------
# Wrapper
# ---------------------------------------------------------------------------
def _round_up(x, m):
    return ((x + m - 1) // m) * m


def prepare_gcn_params(w1, w2):
    """Pad weights to lane-dense (multiple-of-128) feature dims ONCE at init.

    w1 : (S, N, H)  ->  (S, N, Hp)
    w2 : (S, H, C)  ->  (S, Hp, Cp)
    Padding is zeros, so relu(0)=0 and zero W2 rows/cols keep results exact.
    """
    S, N, H = w1.shape
    C = w2.shape[-1]
    Hp = _round_up(H, 128)
    Cp = _round_up(C, 128)
    w1_p = jnp.pad(w1, ((0, 0), (0, 0), (0, Hp - H)))
    w2_p = jnp.pad(w2, ((0, 0), (0, Hp - H), (0, Cp - C)))
    return w1_p, w2_p


def gcn_forward(x, support, w1_p, w2_p, num_classes):
    """GCN forward.

    x        : (N, N)      unused (featureless layer1, matches PyTorch code)
    support  : (S, N, N)   stacked support matrices A_s (passed as-is, no transpose)
    w1_p     : (S, N, Hp)  pre-padded layer-1 weights
    w2_p     : (S, Hp, Cp) pre-padded layer-2 weights
    returns  : (N, num_classes)
    """
    del x  # dropout_rate = 0.0 and featureless=True -> x never enters compute
    S, N, _ = support.shape
    Hp = w1_p.shape[-1]
    Cp = w2_p.shape[-1]

    flops = 2 * S * N * N * (Hp + Cp) + 2 * S * N * Hp * Cp
    bytes_accessed = 4 * (S * N * N + S * N * Hp + S * Hp * Cp + N * Cp)

    out_padded = pl.pallas_call(
        gcn_fused_kernel,
        out_shape=jax.ShapeDtypeStruct((N, Cp), jnp.float32),
        in_specs=[
            pl.BlockSpec(memory_space=pltpu.MemorySpace.VMEM),
            pl.BlockSpec(memory_space=pltpu.MemorySpace.VMEM),
            pl.BlockSpec(memory_space=pltpu.MemorySpace.VMEM),
        ],
        out_specs=pl.BlockSpec(memory_space=pltpu.MemorySpace.VMEM),
        cost_estimate=pl.CostEstimate(
            flops=flops, transcendentals=0, bytes_accessed=bytes_accessed),
    )(support, w1_p, w2_p)

    return out_padded[:, :num_classes]


# ---------------------------------------------------------------------------
# Main
# ---------------------------------------------------------------------------
if __name__ == "__main__":
    # Small shapes: N nodes = input_dim (featureless GCN -> identity features),
    # hidden = 32, num_classes = 16, 2 support matrices.
    S, N, H, C = 2, 64, 32, 16
    key = jax.random.PRNGKey(0)
    k_sup, k_w1, k_w2, k_x = jax.random.split(key, 4)

    support = jax.random.normal(k_sup, (S, N, N), dtype=jnp.float32)
    w1 = jax.random.normal(k_w1, (S, N, H), dtype=jnp.float32)   # layer1 W_i
    w2 = jax.random.normal(k_w2, (S, H, C), dtype=jnp.float32)   # layer2 W_i
    x = jax.random.normal(k_x, (N, N), dtype=jnp.float32)        # unused

    # One-time parameter prep (lane-dense padding), outside the forward path.
    w1_p, w2_p = prepare_gcn_params(w1, w2)
    w1_p, w2_p = jax.block_until_ready((w1_p, w2_p))

    out = jax.block_until_ready(gcn_forward(x, support, w1_p, w2_p, C))

    # Pure-JAX reference check (same f32 semantics as the PyTorch module).
    h_ref = jax.nn.relu(sum(support[i] @ w1[i] for i in range(S)))
    ref = sum(support[i] @ (h_ref @ w2[i]) for i in range(S))
    assert out.shape == (N, C)
    assert jnp.allclose(out, ref, rtol=1e-4, atol=1e-3), "mismatch vs reference"

    print("KERNEL_OK")
</pallas_src>

<mosaic_0001>
module attributes {stable_mosaic.version = 11 : i64} {
  func.func @gcn_fused_kernel(%arg0: memref<2x64x64xf32, #tpu.memory_space<vmem>>, %arg1: memref<2x64x128xf32, #tpu.memory_space<vmem>>, %arg2: memref<2x128x128xf32, #tpu.memory_space<vmem>>, %arg3: memref<64x128xf32, #tpu.memory_space<vmem>>) attributes {dimension_semantics = [], scalar_prefetch = 0 : i64, scratch_operands = 0 : i64, tpu.core_type = #tpu.core_type<tc>} {
    %c0 = arith.constant 0 : index
    %c0_0 = arith.constant 0 : index
    %c0_1 = arith.constant 0 : index
    %0 = vector.load %arg0[%c0, %c0_0, %c0_1] : memref<2x64x64xf32, #tpu.memory_space<vmem>>, vector<1x64x64xf32>
    %1 = vector.shape_cast %0 : vector<1x64x64xf32> to vector<64x64xf32>
    %c0_2 = arith.constant 0 : index
    %c0_3 = arith.constant 0 : index
    %c0_4 = arith.constant 0 : index
    %2 = vector.load %arg1[%c0_2, %c0_3, %c0_4] : memref<2x64x128xf32, #tpu.memory_space<vmem>>, vector<1x64x128xf32>
    %3 = vector.shape_cast %2 : vector<1x64x128xf32> to vector<64x128xf32>
    %cst = arith.constant dense<0.000000e+00> : vector<64x128xf32>
    %4 = tpu.matmul %1, %3, %cst {dimension_numbers = #tpu.dot_dimension_numbers<[1], [0], [0], [1], [0, 0, 1, 1], [], []>} : vector<64x64xf32>, vector<64x128xf32>, vector<64x128xf32> -> vector<64x128xf32>
    %c1 = arith.constant 1 : index
    %c0_5 = arith.constant 0 : index
    %c0_6 = arith.constant 0 : index
    %5 = vector.load %arg0[%c1, %c0_5, %c0_6] : memref<2x64x64xf32, #tpu.memory_space<vmem>>, vector<1x64x64xf32>
    %6 = vector.shape_cast %5 : vector<1x64x64xf32> to vector<64x64xf32>
    %c1_7 = arith.constant 1 : index
    %c0_8 = arith.constant 0 : index
    %c0_9 = arith.constant 0 : index
    %7 = vector.load %arg1[%c1_7, %c0_8, %c0_9] : memref<2x64x128xf32, #tpu.memory_space<vmem>>, vector<1x64x128xf32>
    %8 = vector.shape_cast %7 : vector<1x64x128xf32> to vector<64x128xf32>
    %cst_10 = arith.constant dense<0.000000e+00> : vector<64x128xf32>
    %9 = tpu.matmul %6, %8, %cst_10 {dimension_numbers = #tpu.dot_dimension_numbers<[1], [0], [0], [1], [0, 0, 1, 1], [], []>} : vector<64x64xf32>, vector<64x128xf32>, vector<64x128xf32> -> vector<64x128xf32>
    %10 = arith.addf %4, %9 : vector<64x128xf32>
    %cst_11 = arith.constant 0.000000e+00 : f32
    %11 = vector.broadcast %cst_11 : f32 to vector<64x128xf32>
    %12 = arith.maximumf %10, %11 : vector<64x128xf32>
    %c0_12 = arith.constant 0 : index
    %c0_13 = arith.constant 0 : index
    %c0_14 = arith.constant 0 : index
    %13 = vector.load %arg0[%c0_12, %c0_13, %c0_14] : memref<2x64x64xf32, #tpu.memory_space<vmem>>, vector<1x64x64xf32>
    %14 = vector.shape_cast %13 : vector<1x64x64xf32> to vector<64x64xf32>
    %c0_15 = arith.constant 0 : index
    %c0_16 = arith.constant 0 : index
    %c0_17 = arith.constant 0 : index
    %15 = vector.load %arg2[%c0_15, %c0_16, %c0_17] : memref<2x128x128xf32, #tpu.memory_space<vmem>>, vector<1x128x128xf32>
    %16 = vector.shape_cast %15 : vector<1x128x128xf32> to vector<128x128xf32>
    %cst_18 = arith.constant dense<0.000000e+00> : vector<64x128xf32>
    %17 = tpu.matmul %12, %16, %cst_18 {dimension_numbers = #tpu.dot_dimension_numbers<[1], [0], [0], [1], [0, 0, 1, 1], [], []>} : vector<64x128xf32>, vector<128x128xf32>, vector<64x128xf32> -> vector<64x128xf32>
    %cst_19 = arith.constant dense<0.000000e+00> : vector<64x128xf32>
    %18 = tpu.matmul %14, %17, %cst_19 {dimension_numbers = #tpu.dot_dimension_numbers<[1], [0], [0], [1], [0, 0, 1, 1], [], []>} : vector<64x64xf32>, vector<64x128xf32>, vector<64x128xf32> -> vector<64x128xf32>
    %c1_20 = arith.constant 1 : index
    %c0_21 = arith.constant 0 : index
    %c0_22 = arith.constant 0 : index
    %19 = vector.load %arg0[%c1_20, %c0_21, %c0_22] : memref<2x64x64xf32, #tpu.memory_space<vmem>>, vector<1x64x64xf32>
    %20 = vector.shape_cast %19 : vector<1x64x64xf32> to vector<64x64xf32>
    %c1_23 = arith.constant 1 : index
    %c0_24 = arith.constant 0 : index
    %c0_25 = arith.constant 0 : index
    %21 = vector.load %arg2[%c1_23, %c0_24, %c0_25] : memref<2x128x128xf32, #tpu.memory_space<vmem>>, vector<1x128x128xf32>
    %22 = vector.shape_cast %21 : vector<1x128x128xf32> to vector<128x128xf32>
    %cst_26 = arith.constant dense<0.000000e+00> : vector<64x128xf32>
    %23 = tpu.matmul %12, %22, %cst_26 {dimension_numbers = #tpu.dot_dimension_numbers<[1], [0], [0], [1], [0, 0, 1, 1], [], []>} : vector<64x128xf32>, vector<128x128xf32>, vector<64x128xf32> -> vector<64x128xf32>
    %cst_27 = arith.constant dense<0.000000e+00> : vector<64x128xf32>
    %24 = tpu.matmul %20, %23, %cst_27 {dimension_numbers = #tpu.dot_dimension_numbers<[1], [0], [0], [1], [0, 0, 1, 1], [], []>} : vector<64x64xf32>, vector<64x128xf32>, vector<64x128xf32> -> vector<64x128xf32>
    %25 = arith.addf %18, %24 : vector<64x128xf32>
    %c0_28 = arith.constant 0 : index
    %c0_29 = arith.constant 0 : index
    %26 = vector.load %arg3[%c0_28, %c0_29] : memref<64x128xf32, #tpu.memory_space<vmem>>, vector<64x128xf32>
    tpu.vector_store %arg3[%c0_28, %c0_29], %25 {strides = array<i32>} : memref<64x128xf32, #tpu.memory_space<vmem>>, vector<64x128xf32>,
    return
  }
}

</mosaic_0001>

<bundles_post_ra>
// kernel: tpu_custom_call.1
= control target key start
LH: loop header
LB: loop body
LE: loop exit
PB: predicated region body
PF: predicated region fallthrough
CT: control target
= control target key end

     0   :  { %8 = vsyncpa [#allocation3], 0  ;;  %s1613_s0 = inlined_call_operand.hbm [shape: f32[2,64,64], index: 0, kind: input, shape index: {}]   ;;  %s1614_s1 = inlined_call_operand.hbm [shape: f32[2,64,128], index: 1, kind: input, shape index: {}]   ;;  %s1615_s2 = inlined_call_operand.hbm [shape: f32[2,128,128], index: 2, kind: input, shape index: {}]   ;;  %s1616_s3 = inlined_call_operand.hbm [shape: f32[64,128], index: 3, kind: output, shape index: {}]  }
   0x1   :  { %9 = vsyncpa [#allocation6], 0 }
   0x2   :  { %10 = vsyncpa [#allocation4], 0  ;;  %s1424_s12 = smov [#allocation5]   ;;  %s1425_s14 = smov [#allocation2]  }
   0x3   :  { %s28_s13 = sshll.u32 %s1424_s12, 4  ;;  %s16_s15 = sshll.u32 %s1425_s14, 4  ;;  %s29_s13 = int_to_ptr.vmem [resolvable:$true] %s28_s13  ;;  %s1450_s15 = int_to_ptr.vmem [resolvable:$true] %s16_s15 }
   0x4   :  { %s1330_s18 = scalar_lea.hbm %s1614_s1, 2048 }
   0x5   :  { %p1331_p0 = scmp.ne.s32.totalorder %s1614_s1, %s1330_s18  ;;  %p1334_p1 = scmp.lt.u32.totalorder %s1330_s18, %s1614_s1 }
   0x7   :  { %p1336_p2 = pnand %p1334_p1, %p1331_p0 }
   0x9   :  { %1339 = shalt.err (!%p1336_p2)
}
   0xa   :  { %s1340_s23 = scalar_lea.vmem %s29_s13, 2048  ;;  %p1345_p4 = scmp.lt.s32.totalorder %s29_s13, %s29_s13 }
   0xb   :  { %p1341_p3 = scmp.ne.s32.totalorder %s29_s13, %s1340_s23  ;;  %p1346_p5 = scmp.lt.s32.totalorder %s1340_s23, %s1340_s23 }
   0xd   :  { %p1347_p6 = por %p1346_p5, %p1345_p4 }
   0xf   :  { %p1348_p7 = pnand %p1347_p6, %p1341_p3 }
  0x11   :  { %1351 = shalt.err (!%p1348_p7)
}
  0x12   :  { %s1426_s24 = smov 128   ;;  %s1427_s25 = smov 8  }
  0x13   :  { %34 = dma.hbm_to_vmem [thread:$0]  %s1614_s1, 2048, %s29_s13, [#allocation6], %s1426_s24, %s1426_s24, %s1427_s25  }
  0x14   :  { %s1352_s30 = scalar_lea.hbm %s1613_s0, 2048 }
  0x15   :  { %p1353_p8 = scmp.ne.s32.totalorder %s1613_s0, %s1352_s30  ;;  %p1356_p9 = scmp.lt.u32.totalorder %s1352_s30, %s1613_s0 }
  0x17   :  { %p1358_p10 = pnand %p1356_p9, %p1353_p8 }
  0x19   :  { %1361 = shalt.err (!%p1358_p10)
}
  0x1a   :  { %s1362_s8 = scalar_lea.vmem %s1450_s15, 2048  ;;  %p1367_p12 = scmp.lt.s32.totalorder %s1450_s15, %s1450_s15 }
  0x1b   :  { %p1363_p11 = scmp.ne.s32.totalorder %s1450_s15, %s1362_s8  ;;  %p1368_p13 = scmp.lt.s32.totalorder %s1362_s8, %s1362_s8 }
  0x1d   :  { %p1369_p0 = por %p1368_p13, %p1367_p12 }
  0x1f   :  { %p1370_p1 = pnand %p1369_p0, %p1363_p11 }
  0x21   :  { %1373 = shalt.err (!%p1370_p1)
}
  0x22   :  { %22 = dma.hbm_to_vmem [thread:$0]  %s1613_s0, 2048, %s1450_s15, [#allocation3], %s1426_s24, %s1426_s24, %s1427_s25  }
  0x23   :  { %s1428_s10 = smov [#allocation7]   ;;  %s1374_s14 = scalar_lea.hbm %s1615_s2, 4096 }
  0x24   :  { %s40_s11 = sshll.u32 %s1428_s10, 4  ;;  %p1375_p2 = scmp.ne.s32.totalorder %s1615_s2, %s1374_s14  ;;  %s41_s11 = int_to_ptr.vmem [resolvable:$true] %s40_s11 }
  0x25   :  { %p1378_p3 = scmp.lt.u32.totalorder %s1374_s14, %s1615_s2 }
  0x27   :  { %p1380_p4 = pnand %p1378_p3, %p1375_p2 }
  0x29   :  { %1383 = shalt.err (!%p1380_p4)
}
  0x2a   :  { %s1384_s20 = scalar_lea.vmem %s41_s11, 4096  ;;  %p1389_p6 = scmp.lt.s32.totalorder %s41_s11, %s41_s11 }
  0x2b   :  { %p1385_p5 = scmp.ne.s32.totalorder %s41_s11, %s1384_s20  ;;  %p1390_p7 = scmp.lt.s32.totalorder %s1384_s20, %s1384_s20 }
  0x2d   :  { %p1391_p8 = por %p1390_p7, %p1389_p6 }
  0x2f   :  { %p1392_p9 = pnand %p1391_p8, %p1385_p5 }
  0x31   :  { %1395 = shalt.err (!%p1392_p9)
}
  0x32   :  { %46 = dma.hbm_to_vmem [thread:$0]  %s1615_s2, 4096, %s41_s11, [#allocation6], %s1426_s24, %s1426_s24, %s1427_s25  }
  0x33   :  { %1418 = dma.done.wait [#allocation3], 2048  }
  0x34   :  { %1419 = vsyncadd [#allocation3], 4294965248 }
  0x35   :  { %1420 = dma.done.wait [#allocation6], 6144  }
  0x36   :  { %1421 = vsyncadd [#allocation6], 4294961152  ;;  %v82_v0 = vld [vmem:[#allocation5 + $0x40] sm:$0xff]  ;;  %v83_v1 = vld [vmem:[#allocation5 + $0x48] sm:$0xff]  ;;  %vm90_vm0 = vcmask 523264   ;;  %s1429_s2 = smov [#allocation8]  }
  0x37   :  { %v84_v2 = vld [vmem:[#allocation5 + $0x50] sm:$0xff]  ;;  %v1180_v3 = vpack.c.bf16 %v83_v1, %v82_v0  ;;  %v85_v4 = vld [vmem:[#allocation5 + $0x58] sm:$0xff]  ;;  %v86_v6 = vld [vmem:[#allocation5 + $0x60] sm:$0xff]  ;;  %s823_s21 = sshll.u32 %s1429_s2, 4  ;;  %s824_s21 = int_to_ptr.vmem [resolvable:$true] %s823_s21 }
  0x38   :  { %v1184_v5 = vpack.c.bf16 %v85_v4, %v84_v2  ;;  %v87_v7 = vld [vmem:[#allocation5 + $0x68] sm:$0xff]  ;;  %v1502_v8 = vld [vmem:[#allocation2 + $0x40] sm:$0xff]  ;;  %v88_v10 = vld [vmem:[#allocation5 + $0x70] sm:$0xff]  ;;  %s1396_s22 = scalar_lea.vmem %s824_s21, 1024  ;;  %p1401_p11 = scmp.lt.s32.totalorder %s824_s21, %s824_s21 }
  0x39   :  { %1181 = vmatprep.subr.bf16.mxu0 %v1180_v3  ;;  %996 = vmatprep.mubr.msk.f32.mxu0 %vm90_vm0, %v1502_v8  ;;  %v1188_v9 = vpack.c.bf16 %v87_v7, %v86_v6  ;;  %v89_v11 = vld [vmem:[#allocation5 + $0x78] sm:$0xff]  ;;  %v64_v13 = vld [vmem:[#allocation5] sm:$0xff]  ;;  %v65_v14 = vld [vmem:[#allocation5 + $0x8] sm:$0xff]  ;;  %p1397_p10 = scmp.ne.s32.totalorder %s824_s21, %s1396_s22  ;;  %p1402_p12 = scmp.lt.s32.totalorder %s1396_s22, %s1396_s22 }
  0x3a   :  { %1183 = vmatpush3.bf16.msra.mxu0 %v1180_v3  ;;  %v1192_v12 = vpack.c.bf16 %v89_v11, %v88_v10  ;;  %v357_v15 = vld [vmem:[#allocation7] sm:$0xff]  ;;  %v358_v16 = vld [vmem:[#allocation7 + $0x8] sm:$0xff]  ;;  %v359_v18 = vld [vmem:[#allocation7 + $0x10] sm:$0xff]  ;;  %v1196_v20 = vpack.c.bf16 %v65_v14, %v64_v13 }
  0x3b   :  { %1185 = vmatprep.subr.bf16.mxu0 %v1184_v5  ;;  %v1212_v17 = vpack.c.bf16 %v358_v16, %v357_v15  ;;  %v360_v19 = vld [vmem:[#allocation7 + $0x18] sm:$0xff]  ;;  %v66_v21 = vld [vmem:[#allocation5 + $0x10] sm:$0xff]  ;;  %v361_v24 = vld [vmem:[#allocation7 + $0x20] sm:$0xff]  ;;  %p1403_p13 = por %p1402_p12, %p1401_p11 }
  0x3c   :  { %v1216_v22 = vpack.c.bf16 %v360_v19, %v359_v18  ;;  %v67_v23 = vld [vmem:[#allocation5 + $0x18] sm:$0xff]  ;;  %v362_v25 = vld [vmem:[#allocation7 + $0x28] sm:$0xff]  ;;  %v1508_v27 = vld [vmem:[#allocation2 + $0x50] sm:$0xff] }
  0x3d   :  { %1213 = vmatprep.subr.bf16.mxu1 %v1212_v17  ;;  %v1506_v26 = vld [vmem:[#allocation2 + $0x48] sm:$0xff]  ;;  %v1200_v28 = vpack.c.bf16 %v67_v23, %v66_v21  ;;  %v68_v29 = vld [vmem:[#allocation5 + $0x20] sm:$0xff]  ;;  %v1220_v30 = vpack.c.bf16 %v362_v25, %v361_v24  ;;  %v363_v32 = vld [vmem:[#allocation7 + $0x30] sm:$0xff]  ;;  %p1404_p0 = pnand %p1403_p13, %p1397_p10 }
  0x3e   :  { %1187 = vmatpush3.bf16.msra.mxu0 %v1184_v5  ;;  %1215 = vmatpush3.bf16.msra.mxu1 %v1212_v17  ;;  %v69_v31 = vld [vmem:[#allocation5 + $0x28] sm:$0xff]  ;;  %v364_v33 = vld [vmem:[#allocation7 + $0x38] sm:$0xff]  ;;  %v1516_v35 = vld [vmem:[#allocation2 + $0x60] sm:$0xff] }
  0x3f   :  { %1189 = vmatprep.subr.bf16.mxu0 %v1188_v9  ;;  %1217 = vmatprep.subr.bf16.mxu1 %v1216_v22  ;;  %v1514_v34 = vld [vmem:[#allocation2 + $0x58] sm:$0xff]  ;;  %v1204_v36 = vpack.c.bf16 %v69_v31, %v68_v29  ;;  %v70_v37 = vld [vmem:[#allocation5 + $0x30] sm:$0xff]  ;;  %v1224_v38 = vpack.c.bf16 %v364_v33, %v363_v32  ;;  %v365_v40 = vld [vmem:[#allocation7 + $0x40] sm:$0xff] }
  0x40   :  { %v71_v39 = vld [vmem:[#allocation5 + $0x38] sm:$0xff]  ;;  %v366_v41 = vld [vmem:[#allocation7 + $0x48] sm:$0xff]  ;;  %v1524_v43 = vld [vmem:[#allocation2 + $0x70] sm:$0xff] }
  0x41   :  { %v1522_v42 = vld [vmem:[#allocation2 + $0x68] sm:$0xff]  ;;  %v1208_v44 = vpack.c.bf16 %v71_v39, %v70_v37  ;;  %v479_v45 = vld [vmem:[#allocation7 + $0x80] sm:$0xff]  ;;  %v1228_v46 = vpack.c.bf16 %v366_v41, %v365_v40  ;;  %v367_v48 = vld [vmem:[#allocation7 + $0x50] sm:$0xff] }
  0x42   :  { %1191 = vmatpush3.bf16.msra.mxu0 %v1188_v9  ;;  %1219 = vmatpush3.bf16.msra.mxu1 %v1216_v22  ;;  %v480_v47 = vld [vmem:[#allocation7 + $0x88] sm:$0xff]  ;;  %v368_v49 = vld [vmem:[#allocation7 + $0x58] sm:$0xff]  ;;  %v1532_v51 = vld [vmem:[#allocation2] sm:$0xff] }
  0x43   :  { %1193 = vmatprep.subr.bf16.mxu0 %v1192_v12  ;;  %1221 = vmatprep.subr.bf16.mxu1 %v1220_v30  ;;  %v1530_v50 = vld [vmem:[#allocation2 + $0x78] sm:$0xff]  ;;  %v1244_v52 = vpack.c.bf16 %v480_v47, %v479_v45  ;;  %v481_v53 = vld [vmem:[#allocation7 + $0x90] sm:$0xff]  ;;  %v1232_v54 = vpack.c.bf16 %v368_v49, %v367_v48  ;;  %v369_v56 = vld [vmem:[#allocation7 + $0x60] sm:$0xff] }
  0x44   :  { %v482_v55 = vld [vmem:[#allocation7 + $0x98] sm:$0xff]  ;;  %v370_v57 = vld [vmem:[#allocation7 + $0x68] sm:$0xff]  ;;  %v1540_v59 = vld [vmem:[#allocation2 + $0x10] sm:$0xff] }
  0x45   :  { %v1538_v58 = vld [vmem:[#allocation2 + $0x8] sm:$0xff]  ;;  %v1248_v60 = vpack.c.bf16 %v482_v55, %v481_v53  ;;  %v1236_v61 = vpack.c.bf16 %v370_v57, %v369_v56  ;;  %v483_v62 = vld [vmem:[#allocation7 + $0xa0] sm:$0xff]  ;;  %v1546_v0 = vld [vmem:[#allocation2 + $0x18] sm:$0xff] }
  0x46   :  { %1195 = vmatpush3.bf16.msra.mxu0 %v1192_v12  ;;  %1223 = vmatpush3.bf16.msra.mxu1 %v1220_v30  ;;  %v484_v63 = vld [vmem:[#allocation7 + $0xa8] sm:$0xff]  ;;  %v1548_v1 = vld [vmem:[#allocation2 + $0x20] sm:$0xff]  ;;  %v485_v3 = vld [vmem:[#allocation7 + $0xb0] sm:$0xff] }
  0x47   :  { %1197 = vmatprep.subr.bf16.mxu0 %v1196_v20  ;;  %1225 = vmatprep.subr.bf16.mxu1 %v1224_v38  ;;  %v1252_v2 = vpack.c.bf16 %v484_v63, %v483_v62  ;;  %v486_v4 = vld [vmem:[#allocation7 + $0xb8] sm:$0xff]  ;;  %v1554_v5 = vld [vmem:[#allocation2 + $0x28] sm:$0xff]  ;;  %v1556_v6 = vld [vmem:[#allocation2 + $0x30] sm:$0xff] }
  0x48   :  { %v1256_v7 = vpack.c.bf16 %v486_v4, %v485_v3  ;;  %v487_v9 = vld [vmem:[#allocation7 + $0xc0] sm:$0xff]  ;;  %v488_v10 = vld [vmem:[#allocation7 + $0xc8] sm:$0xff]  ;;  %v1562_v11 = vld [vmem:[#allocation2 + $0x38] sm:$0xff] }
  0x49   :  { %997 = vmatmul.mubr.msk.f32.vlgmr.msra.gmra.mrb[0].mxu0 %vm90_vm0, %v1506_v26  ;;  %v1260_v12 = vpack.c.bf16 %v488_v10, %v487_v9  ;;  %v489_v13 = vld [vmem:[#allocation7 + $0xd0] sm:$0xff]  ;;  %v490_v14 = vld [vmem:[#allocation7 + $0xd8] sm:$0xff]  ;;  %v491_v16 = vld [vmem:[#allocation7 + $0xe0] sm:$0xff] }
  0x4a   :  { %1199 = vmatpush3.bf16.msra.mxu0 %v1196_v20  ;;  %999 = vmatprep.mubr.msk.f32.mxu0 %vm90_vm0, %v1508_v27  ;;  %v1264_v15 = vpack.c.bf16 %v490_v14, %v489_v13  ;;  %v492_v17 = vld [vmem:[#allocation7 + $0xe8] sm:$0xff]  ;;  %v371_v19 = vld [vmem:[#allocation7 + $0x70] sm:$0xff]  ;;  %v372_v20 = vld [vmem:[#allocation7 + $0x78] sm:$0xff] }
  0x4b   :  { %1201 = vmatprep.subr.bf16.mxu0 %v1200_v28  ;;  %1227 = vmatpush3.bf16.msra.mxu1 %v1224_v38  ;;  %v1268_v18 = vpack.c.bf16 %v492_v17, %v491_v16  ;;  %v493_v21 = vld [vmem:[#allocation7 + $0xf0] sm:$0xff]  ;;  %v1240_v22 = vpack.c.bf16 %v372_v20, %v371_v19  ;;  %v494_v23 = vld [vmem:[#allocation7 + $0xf8] sm:$0xff] }
  0x4c   :  { %1229 = vmatprep.subr.bf16.mxu1 %v1228_v46  ;;  %v1272_v24 = vpack.c.bf16 %v494_v23, %v493_v21 }
  0x4d   :  { %1000 = vmatmul.mubr.msk.f32.gmra.mrb[2].mxu0 %vm90_vm0, %v1514_v34 }
  0x4e   :  { %1203 = vmatpush3.bf16.msra.mxu0 %v1200_v28  ;;  %1002 = vmatprep.mubr.msk.f32.mxu0 %vm90_vm0, %v1516_v35 }
  0x4f   :  { %1205 = vmatprep.subr.bf16.mxu0 %v1204_v36  ;;  %1231 = vmatpush3.bf16.msra.mxu1 %v1228_v46 }
  0x50   :  { %1233 = vmatprep.subr.bf16.mxu1 %v1232_v54 }
  0x51   :  { %1003 = vmatmul.mubr.msk.f32.gmra.mrb[4].mxu0 %vm90_vm0, %v1522_v42 }
  0x52   :  { %1207 = vmatpush3.bf16.msra.mxu0 %v1204_v36  ;;  %1005 = vmatprep.mubr.msk.f32.mxu0 %vm90_vm0, %v1524_v43 }
  0x53   :  { %1209 = vmatprep.subr.bf16.mxu0 %v1208_v44  ;;  %1235 = vmatpush3.bf16.msra.mxu1 %v1232_v54 }
  0x54   :  { %1237 = vmatprep.subr.bf16.mxu1 %v1236_v61 }
  0x55   :  { %1006 = vmatmul.mubr.msk.f32.gmra.mrb[6].mxu0 %vm90_vm0, %v1530_v50 }
  0x56   :  { %1211 = vmatpush3.bf16.msra.mxu0 %v1208_v44  ;;  %1024 = vmatprep.mubr.msk.f32.mxu0 %vm90_vm0, %v1532_v51 }
  0x57   :  { %1245 = vmatprep.subr.bf16.mxu0 %v1244_v52  ;;  %1239 = vmatpush3.bf16.msra.mxu1 %v1236_v61 }
  0x58   :  { %1241 = vmatprep.subr.bf16.mxu1 %v1240_v22 }
  0x59   :  { %1025 = vmatmul.mubr.msk.f32.vlgmr.msra.gmra.mrb[0].mxu0 %vm90_vm0, %v1538_v58 }
  0x5a   :  { %1027 = vmatprep.mubr.msk.f32.mxu0 %vm90_vm0, %v1540_v59  ;;  %1247 = vmatpush3.bf16.msra.mxu0 %v1244_v52 }
  0x5b   :  { %1249 = vmatprep.subr.bf16.mxu0 %v1248_v60  ;;  %1243 = vmatpush3.bf16.msra.mxu1 %v1240_v22 }
  0x5d   :  { %1028 = vmatmul.mubr.msk.f32.gmra.mrb[2].mxu0 %vm90_vm0, %v1546_v0 }
  0x5e   :  { %1030 = vmatprep.mubr.msk.f32.mxu0 %vm90_vm0, %v1548_v1  ;;  %1251 = vmatpush3.bf16.msra.mxu0 %v1248_v60 }
  0x5f   :  { %1253 = vmatprep.subr.bf16.mxu0 %v1252_v2 }
  0x61   :  { %1031 = vmatmul.mubr.msk.f32.gmra.mrb[4].mxu0 %vm90_vm0, %v1554_v5 }
  0x62   :  { %1033 = vmatprep.mubr.msk.f32.mxu0 %vm90_vm0, %v1556_v6  ;;  %1255 = vmatpush3.bf16.msra.mxu0 %v1252_v2 }
  0x63   :  { %1257 = vmatprep.subr.bf16.mxu0 %v1256_v7 }
  0x65   :  { %1034 = vmatmul.mubr.msk.f32.gmra.mrb[6].mxu0 %vm90_vm0, %v1562_v11 }
  0x66   :  { %1259 = vmatpush3.bf16.msra.mxu0 %v1256_v7 }
  0x67   :  { %1261 = vmatprep.subr.bf16.mxu0 %v1260_v12 }
  0x6a   :  { %1263 = vmatpush3.bf16.msra.mxu0 %v1260_v12 }
  0x6b   :  { %1265 = vmatprep.subr.bf16.mxu0 %v1264_v15 }
  0x6e   :  { %1267 = vmatpush3.bf16.msra.mxu0 %v1264_v15 }
  0x6f   :  { %1269 = vmatprep.subr.bf16.mxu0 %v1268_v18 }
  0x72   :  { %1271 = vmatpush3.bf16.msra.mxu0 %v1268_v18 }
  0x73   :  { %1273 = vmatprep.subr.bf16.mxu0 %v1272_v24 }
  0x76   :  { %1275 = vmatpush3.bf16.msra.mxu0 %v1272_v24 }
 0x12c   :  { %v1026_v25 = vpop.f32.mrb[0].mxu0 }
 0x12d   :  { %v310_v28 = vpop.f32.mrb[1].mxu0  ;;  %v350_v30 = vmax.f32 %v1026_v25, 0.0 }
 0x12e   :  { %v349_v29 = vmax.f32 %v310_v28, 0.0 }
 0x130   :  { %v1029_v31 = vpop.f32.mrb[2].mxu0  ;;  %1068 = vmatprep.mubr.f32.mxu1 %v349_v29  ;;  %1112 = vmatprep.mubr.f32.mxu0 %v349_v29 }
 0x131   :  { %v320_v32 = vpop.f32.mrb[3].mxu0  ;;  %1069 = vmatmul.mubr.f32.vlgmr.msra.gmra.mrb[0].mxu1 %v350_v30  ;;  %1113 = vmatmul.mubr.f32.vlgmr.msra.gmra.mrb[8].mxu0 %v350_v30  ;;  %v352_v36 = vmax.f32 %v1029_v31, 0.0 }
 0x132   :  { %v351_v33 = vmax.f32 %v320_v32, 0.0 }
 0x134   :  { %v1032_v37 = vpop.f32.mrb[4].mxu0  ;;  %1071 = vmatprep.mubr.f32.mxu1 %v351_v33  ;;  %1115 = vmatprep.mubr.f32.mxu0 %v351_v33 }
 0x135   :  { %v330_v38 = vpop.f32.mrb[5].mxu0  ;;  %1072 = vmatmul.mubr.f32.gmra.mrb[2].mxu1 %v352_v36  ;;  %1116 = vmatmul.mubr.f32.gmra.mrb[10].mxu0 %v352_v36  ;;  %v354_v40 = vmax.f32 %v1032_v37, 0.0 }
 0x136   :  { %v353_v39 = vmax.f32 %v330_v38, 0.0 }
 0x138   :  { %v1035_v41 = vpop.f32.mrb[6].mxu0  ;;  %1074 = vmatprep.mubr.f32.mxu1 %v353_v39  ;;  %1118 = vmatprep.mubr.f32.mxu0 %v353_v39 }
 0x139   :  { %v340_v44 = vpop.f32.mrb[7].mxu0  ;;  %1075 = vmatmul.mubr.f32.gmra.mrb[4].mxu1 %v354_v40  ;;  %1119 = vmatmul.mubr.f32.gmra.mrb[12].mxu0 %v354_v40  ;;  %v356_v46 = vmax.f32 %v1035_v41, 0.0 }
 0x13a   :  { %v355_v45 = vmax.f32 %v340_v44, 0.0 }
 0x13c   :  { %1077 = vmatprep.mubr.f32.mxu1 %v355_v45  ;;  %1121 = vmatprep.mubr.f32.mxu0 %v355_v45 }
 0x13d   :  { %1078 = vmatmul.mubr.f32.gmra.mrb[6].mxu1 %v356_v46  ;;  %1122 = vmatmul.mubr.f32.gmra.mrb[14].mxu0 %v356_v46 }
 0x13e   :  { %1140 = vmatprep.mubr.msk.f32.mxu1 %vm90_vm0, %v1502_v8 }
 0x204   :  { %v1070_v47 = vpop.f32.mrb[0].mxu1  ;;  %v1114_v48 = vpop.f32.mrb[8].mxu0 }
 0x205   :  { %v439_v49 = vpop.f32.mrb[1].mxu1  ;;  %v561_v52 = vpop.f32.mrb[9].mxu0 }
 0x206   :  { %v1292_v53 = vpack.c.bf16 %v1070_v47, %v439_v49  ;;  %v1276_v54 = vpack.c.bf16 %v1114_v48, %v561_v52 }
 0x208   :  { %v1073_v55 = vpop.f32.mrb[2].mxu1  ;;  %v1117_v56 = vpop.f32.mrb[10].mxu0  ;;  %1277 = vmatprep.subr.bf16.mxu1 %v1276_v54 }
 0x209   :  { %v449_v57 = vpop.f32.mrb[3].mxu1  ;;  %v571_v60 = vpop.f32.mrb[11].mxu0  ;;  %1279 = vmatpush3.bf16.msra.mxu1 %v1276_v54 }
 0x20a   :  { %v1296_v61 = vpack.c.bf16 %v1073_v55, %v449_v57  ;;  %v1280_v62 = vpack.c.bf16 %v1117_v56, %v571_v60 }
 0x20c   :  { %v1076_v63 = vpop.f32.mrb[4].mxu1  ;;  %v1120_v2 = vpop.f32.mrb[12].mxu0  ;;  %1281 = vmatprep.subr.bf16.mxu1 %v1280_v62 }
 0x20d   :  { %v459_v3 = vpop.f32.mrb[5].mxu1  ;;  %v581_v4 = vpop.f32.mrb[13].mxu0  ;;  %1283 = vmatpush3.bf16.msra.mxu1 %v1280_v62 }
 0x20e   :  { %v1300_v8 = vpack.c.bf16 %v1076_v63, %v459_v3  ;;  %v1284_v7 = vpack.c.bf16 %v1120_v2, %v581_v4 }
 0x210   :  { %v1079_v9 = vpop.f32.mrb[6].mxu1  ;;  %v1123_v10 = vpop.f32.mrb[14].mxu0  ;;  %1285 = vmatprep.subr.bf16.mxu1 %v1284_v7 }
 0x211   :  { %v469_v12 = vpop.f32.mrb[7].mxu1  ;;  %v591_v13 = vpop.f32.mrb[15].mxu0  ;;  %1287 = vmatpush3.bf16.msra.mxu1 %v1284_v7 }
 0x212   :  { %v1304_v14 = vpack.c.bf16 %v1079_v9, %v469_v12  ;;  %v1288_v15 = vpack.c.bf16 %v1123_v10, %v591_v13 }
 0x214   :  { %1289 = vmatprep.subr.bf16.mxu1 %v1288_v15 }
 0x215   :  { %1291 = vmatpush3.bf16.msra.mxu1 %v1288_v15 }
 0x216   :  { %1293 = vmatprep.subr.bf16.mxu1 %v1292_v53 }
 0x218   :  { %1141 = vmatmul.mubr.msk.f32.vlgmr.msra.gmra.mrb[8].mxu1 %vm90_vm0, %v1506_v26 }
 0x219   :  { %1295 = vmatpush3.bf16.msra.mxu1 %v1292_v53  ;;  %1143 = vmatprep.mubr.msk.f32.mxu1 %vm90_vm0, %v1508_v27 }
 0x21a   :  { %1297 = vmatprep.subr.bf16.mxu1 %v1296_v61 }
 0x21c   :  { %1144 = vmatmul.mubr.msk.f32.gmra.mrb[10].mxu1 %vm90_vm0, %v1514_v34 }
 0x21d   :  { %1299 = vmatpush3.bf16.msra.mxu1 %v1296_v61  ;;  %1146 = vmatprep.mubr.msk.f32.mxu1 %vm90_vm0, %v1516_v35 }
 0x21e   :  { %1301 = vmatprep.subr.bf16.mxu1 %v1300_v8 }
 0x220   :  { %1147 = vmatmul.mubr.msk.f32.gmra.mrb[12].mxu1 %vm90_vm0, %v1522_v42 }
 0x221   :  { %1303 = vmatpush3.bf16.msra.mxu1 %v1300_v8  ;;  %1149 = vmatprep.mubr.msk.f32.mxu1 %vm90_vm0, %v1524_v43 }
 0x222   :  { %1305 = vmatprep.subr.bf16.mxu1 %v1304_v14 }
 0x224   :  { %1150 = vmatmul.mubr.msk.f32.gmra.mrb[14].mxu1 %vm90_vm0, %v1530_v50 }
 0x225   :  { %1307 = vmatpush3.bf16.msra.mxu1 %v1304_v14  ;;  %1168 = vmatprep.mubr.msk.f32.mxu1 %vm90_vm0, %v1532_v51 }
 0x228   :  { %1169 = vmatmul.mubr.msk.f32.vlgmr.msra.gmra.mrb[8].mxu1 %vm90_vm0, %v1538_v58 }
 0x229   :  { %1171 = vmatprep.mubr.msk.f32.mxu1 %vm90_vm0, %v1540_v59 }
 0x22c   :  { %1172 = vmatmul.mubr.msk.f32.gmra.mrb[10].mxu1 %vm90_vm0, %v1546_v0 }
 0x22d   :  { %1174 = vmatprep.mubr.msk.f32.mxu1 %vm90_vm0, %v1548_v1 }
 0x230   :  { %1175 = vmatmul.mubr.msk.f32.gmra.mrb[12].mxu1 %vm90_vm0, %v1554_v5 }
 0x231   :  { %1177 = vmatprep.mubr.msk.f32.mxu1 %vm90_vm0, %v1556_v6 }
 0x234   :  { %1178 = vmatmul.mubr.msk.f32.gmra.mrb[14].mxu1 %vm90_vm0, %v1562_v11 }
 0x2fb   :  { %v1170_v26 = vpop.f32.mrb[8].mxu1 }
 0x2fc   :  { %811 = vst [vmem:[#allocation8 + $0x8] sm:$0xff] %v1170_v26  ;;  %v771_v27 = vpop.f32.mrb[9].mxu1 }
 0x2fd   :  { %810 = vst [vmem:[#allocation8] sm:$0xff] %v771_v27 }
 0x2ff   :  { %v1173_v34 = vpop.f32.mrb[10].mxu1 }
 0x300   :  { %813 = vst [vmem:[#allocation8 + $0x18] sm:$0xff] %v1173_v34  ;;  %v781_v35 = vpop.f32.mrb[11].mxu1 }
 0x301   :  { %812 = vst [vmem:[#allocation8 + $0x10] sm:$0xff] %v781_v35 }
 0x303   :  { %v1176_v42 = vpop.f32.mrb[12].mxu1 }
 0x304   :  { %815 = vst [vmem:[#allocation8 + $0x28] sm:$0xff] %v1176_v42  ;;  %v791_v43 = vpop.f32.mrb[13].mxu1 }
 0x305   :  { %814 = vst [vmem:[#allocation8 + $0x20] sm:$0xff] %v791_v43 }
 0x307   :  { %v1179_v50 = vpop.f32.mrb[14].mxu1 }
 0x308   :  { %817 = vst [vmem:[#allocation8 + $0x38] sm:$0xff] %v1179_v50  ;;  %v801_v51 = vpop.f32.mrb[15].mxu1 }
 0x309   :  { %816 = vst [vmem:[#allocation8 + $0x30] sm:$0xff] %v801_v51 }
 0x30a   :  { %1407 = shalt.err (!%p1404_p0)
}
 0x30b   :  { %s1408_s27 = scalar_lea.hbm %s1616_s3, 1024 }
 0x30c   :  { %p1409_p1 = scmp.ne.s32.totalorder %s1616_s3, %s1408_s27  ;;  %p1412_p2 = scmp.lt.u32.totalorder %s1408_s27, %s1616_s3 }
 0x30e   :  { %p1414_p3 = pnand %p1412_p2, %p1409_p1 }
 0x310   :  { %1417 = shalt.err (!%p1414_p3)
}
 0x311   :  { %829 = dma.vmem_to_hbm [thread:$0]  %s824_s21, 1024, %s1616_s3, [#allocation4], %s1426_s24, %s1426_s24, %s1427_s25  }
 0x312   :  { %1422 = dma.done.wait [#allocation4], 1024  }
 0x313   :  { %1423 = vsyncadd [#allocation4], 4294966272 }
 0x314   :  { %833 = vsyncpa [#allocation3], 1 }
 0x315   :  { %834 = vsyncpa [#allocation6], 1 }
 0x316   :  { %835 = vsyncpa [#allocation4], 1 }

</bundles_post_ra>
